<compile_context>
chip_gen: v6e
topology: v6e:2x2x1
jax: 0.10.0
libtpu: 0.0.40
codegen_flags: <defaults>
</compile_context>

<pallas_src>
import math

import jax
import jax.numpy as jnp
from jax import lax
from jax.experimental import pallas as pl
from jax.experimental.pallas import tpu as pltpu


# Per-call tile budget for double-buffered in+out tiles (conservative for
# v7x's 64 MiB physical / 32 MiB scoped-default VMEM; plenty on v5e/v6e).
_VMEM_TILE_BUDGET = 16 * 1024 * 1024
_MAX_BLOCK_ROWS = 4096  # packed rows per tile


def _round_up(x: int, m: int) -> int:
    return ((x + m - 1) // m) * m


def _message_receiver_kernel(m_ref, w_ref, b_ref, o_ref):
    # m_ref: [TB, Kp]   packed batch tile (Kp = pack * n_m, lane-dense)
    # w_ref: [Kp, Np]   block-diagonal W^T (resident across the grid)
    # b_ref: [1,  Np]   tiled bias (resident)
    # o_ref: [TB, Np]   packed output tile (Np = pack * n, lane-dense)
    y = jnp.dot(m_ref[...], w_ref[...], preferred_element_type=jnp.float32)
    y = y + b_ref[...].astype(jnp.float32)

    # Exact GELU (erf-based), matching PyTorch nn.GELU() default:
    #   gelu(y) = 0.5 * y * (1 + erf(y / sqrt(2)))
    g = 0.5 * y * (1.0 + lax.erf(y * (1.0 / math.sqrt(2.0))))

    o_ref[...] = g.astype(o_ref.dtype)


def message_receiver(
    m_t: jax.Array,
    weight: jax.Array,
    bias: jax.Array,
    *,
    block_rows: int | None = None,
) -> jax.Array:
    """Forward pass of MessageReceiver: GELU(m_t @ W^T + b).

    m_t:    [B, n_m]
    weight: [n, n_m]   (PyTorch nn.Linear layout)
    bias:   [n]
    returns [B, n]
    """
    B, n_m = m_t.shape
    n = weight.shape[0]
    assert weight.shape == (n, n_m)
    assert bias.shape == (n,)

    # Lane-pack `pack` batch rows per packed row when the feature dims are
    # small (the typical case for this module); pack=1 falls back to the
    # plain layout for already-wide feature dims.
    pack = 8 if max(n_m, n) <= 128 else 1
    Kp, Np = pack * n_m, pack * n

    # Packing reshape needs B % pack == 0: pad at most pack-1 rows.
    # (Only triggers when B is not a multiple of 8; glue, sliced off below.)
    B_pk = _round_up(B, pack)
    m_in = m_t if B_pk == B else jnp.pad(m_t, ((0, B_pk - B), (0, 0)))
    P = B_pk // pack
    m_packed = m_in.reshape(P, Kp)  # free row-major view

    # One-time packed parameters: block-diagonal W^T and tiled bias.
    w_packed = jnp.kron(jnp.eye(pack, dtype=weight.dtype), weight.T)  # [Kp, Np]
    b_packed = jnp.tile(bias, pack).reshape(1, Np)                    # [1,  Np]

    itemsize = jnp.dtype(m_t.dtype).itemsize

    # Packed-row tile: as big as the VMEM budget allows (amortize per-step
    # overhead), multiple of 8, capped; keep >=2 grid steps when there is
    # enough work so both v7x TensorCores get a share of the parallel axis.
    if block_rows is None:
        bytes_per_row = (Kp + Np) * itemsize
        cap = max(8, (_VMEM_TILE_BUDGET // (2 * bytes_per_row)) // 8 * 8)
        block_rows = min(cap, _MAX_BLOCK_ROWS, _round_up(P, 8))
        if block_rows >= P and P > 8:
            block_rows = _round_up(pl.cdiv(P, 2), 8)
    block_rows = max(8, _round_up(block_rows, 8))

    grid = (pl.cdiv(P, block_rows),)  # partial final block handled by Pallas

    cost = pl.CostEstimate(
        flops=2 * B * n_m * n,
        transcendentals=B * n,
        bytes_accessed=B * (n_m + n) * itemsize + (Kp * Np + Np) * itemsize,
    )

    out = pl.pallas_call(
        _message_receiver_kernel,
        out_shape=jax.ShapeDtypeStruct((P, Np), m_t.dtype),
        grid_spec=pltpu.PrefetchScalarGridSpec(
            num_scalar_prefetch=0,
            grid=grid,
            in_specs=[
                pl.BlockSpec((block_rows, Kp), lambda i: (i, 0)),  # batch-tiled
                pl.BlockSpec((Kp, Np), lambda i: (0, 0)),          # resident weight
                pl.BlockSpec((1, Np), lambda i: (0, 0)),           # resident bias
            ],
            out_specs=pl.BlockSpec((block_rows, Np), lambda i: (i, 0)),
        ),
        compiler_params=pltpu.CompilerParams(
            dimension_semantics=("parallel",),
            vmem_limit_bytes=32 * 1024 * 1024,
        ),
        cost_estimate=cost,
    )(m_packed, w_packed, b_packed)

    out = out.reshape(B_pk, n)  # un-pack: free row-major view
    return out if B_pk == B else out[:B]


def _ref_forward(m_t, weight, bias):
    y = m_t @ weight.T + bias
    return 0.5 * y * (1.0 + lax.erf(y / math.sqrt(2.0)))


if __name__ == "__main__":
    key = jax.random.PRNGKey(0)
    k_m, k_w, k_b, k_m2 = jax.random.split(key, 4)

    # Module hyper-params: n_m (message dim) -> n (hidden dim)
    B, n_m, n = 8, 16, 32

    m_t = jax.random.normal(k_m, (B, n_m), dtype=jnp.float32)

    # Deterministic "init" mimicking nn.Linear's uniform(-1/sqrt(n_m), 1/sqrt(n_m))
    bound = 1.0 / math.sqrt(n_m)
    weight = jax.random.uniform(k_w, (n, n_m), jnp.float32, -bound, bound)
    bias = jax.random.uniform(k_b, (n,), jnp.float32, -bound, bound)

    # Small case (single packed tile).
    out = jax.block_until_ready(message_receiver(m_t, weight, bias))
    ref = _ref_forward(m_t, weight, bias)
    assert out.shape == (B, n)
    assert jnp.allclose(out, ref, atol=1e-5, rtol=1e-5), "mismatch vs reference (small)"

    # Larger ragged case: non-multiple-of-8 batch, multi-step grid with a
    # partial final block (exercises packing pad + masked tail block).
    B2 = 1003
    m_t2 = jax.random.normal(k_m2, (B2, n_m), dtype=jnp.float32)
    out2 = jax.block_until_ready(message_receiver(m_t2, weight, bias))
    ref2 = _ref_forward(m_t2, weight, bias)
    assert out2.shape == (B2, n)
    assert jnp.allclose(out2, ref2, atol=1e-5, rtol=1e-5), "mismatch vs reference (tiled)"

    print("KERNEL_OK")
</pallas_src>

<mosaic_0001>
module attributes {stable_mosaic.version = 11 : i64} {
  func.func @_message_receiver_kernel(%arg0: i32, %arg1: memref<8x128xf32, #tpu.memory_space<vmem>>, %arg2: memref<128x256xf32, #tpu.memory_space<vmem>>, %arg3: memref<1x256xf32, #tpu.memory_space<vmem>>, %arg4: memref<8x256xf32, #tpu.memory_space<vmem>>) attributes {dimension_semantics = [#tpu.dimension_semantics<parallel>], iteration_bounds = array<i64: 1>, scalar_prefetch = 0 : i64, scratch_operands = 0 : i64, tpu.core_type = #tpu.core_type<tc>, window_params = [{transform_indices = @transform_0, window_bounds = array<i64: 8, 128>}, {pipeline_mode = #tpu.pipeline_mode<synchronous>, transform_indices = @transform_1, window_bounds = array<i64: 128, 256>}, {pipeline_mode = #tpu.pipeline_mode<synchronous>, transform_indices = @transform_2, window_bounds = array<i64: 1, 256>}, {transform_indices = @transform_3, window_bounds = array<i64: 8, 256>}]} {
    %c0 = arith.constant 0 : index
    %c0_0 = arith.constant 0 : index
    %0 = vector.load %arg1[%c0, %c0_0] : memref<8x128xf32, #tpu.memory_space<vmem>>, vector<8x128xf32>
    %c0_1 = arith.constant 0 : index
    %c0_2 = arith.constant 0 : index
    %1 = vector.load %arg2[%c0_1, %c0_2] : memref<128x256xf32, #tpu.memory_space<vmem>>, vector<128x256xf32>
    %cst = arith.constant dense<0.000000e+00> : vector<8x256xf32>
    %2 = tpu.matmul %0, %1, %cst {dimension_numbers = #tpu.dot_dimension_numbers<[1], [0], [0], [1], [0, 0, 1, 1], [], []>} : vector<8x128xf32>, vector<128x256xf32>, vector<8x256xf32> -> vector<8x256xf32>
    %c0_3 = arith.constant 0 : index
    %c0_4 = arith.constant 0 : index
    %3 = vector.load %arg3[%c0_3, %c0_4] : memref<1x256xf32, #tpu.memory_space<vmem>>, vector<1x256xf32>
    %4 = vector.broadcast %3 : vector<1x256xf32> to vector<8x256xf32>
    %5 = arith.addf %2, %4 : vector<8x256xf32>
    %cst_5 = arith.constant 5.000000e-01 : f32
    %6 = vector.broadcast %cst_5 : f32 to vector<8x256xf32>
    %7 = arith.mulf %6, %5 : vector<8x256xf32>
    %cst_6 = arith.constant 0.707106769 : f32
    %8 = vector.broadcast %cst_6 : f32 to vector<8x256xf32>
    %9 = arith.mulf %5, %8 : vector<8x256xf32>
    %10 = math.erf %9 : vector<8x256xf32>
    %cst_7 = arith.constant 1.000000e+00 : f32
    %11 = vector.broadcast %cst_7 : f32 to vector<8x256xf32>
    %12 = arith.addf %11, %10 : vector<8x256xf32>
    %13 = arith.mulf %7, %12 : vector<8x256xf32>
    %c0_8 = arith.constant 0 : index
    %c0_9 = arith.constant 0 : index
    %14 = vector.load %arg4[%c0_8, %c0_9] : memref<8x256xf32, #tpu.memory_space<vmem>>, vector<8x256xf32>
    tpu.vector_store %arg4[%c0_8, %c0_9], %13 {strides = array<i32>} : memref<8x256xf32, #tpu.memory_space<vmem>>, vector<8x256xf32>,
    return
  }
  func.func @transform_0(%arg0: i32) -> (i32, i32) {
    %c0_i32 = arith.constant 0 : i32
    %c0_i32_0 = arith.constant 0 : i32
    return %arg0, %c0_i32 : i32, i32
  }
  func.func @transform_1(%arg0: i32) -> (i32, i32) {
    %c0_i32 = arith.constant 0 : i32
    %c0_i32_0 = arith.constant 0 : i32
    %c0_i32_1 = arith.constant 0 : i32
    return %c0_i32, %c0_i32_0 : i32, i32
  }
  func.func @transform_2(%arg0: i32) -> (i32, i32) {
    %c0_i32 = arith.constant 0 : i32
    %c0_i32_0 = arith.constant 0 : i32
    %c0_i32_1 = arith.constant 0 : i32
    return %c0_i32, %c0_i32_0 : i32, i32
  }
  func.func @transform_3(%arg0: i32) -> (i32, i32) {
    %c0_i32 = arith.constant 0 : i32
    %c0_i32_0 = arith.constant 0 : i32
    return %arg0, %c0_i32 : i32, i32
  }
}

</mosaic_0001>

<bundles_post_ra>
// kernel: tpu_custom_call.1
= control target key start
LH: loop header
LB: loop body
LE: loop exit
PB: predicated region body
PF: predicated region fallthrough
CT: control target
= control target key end

     0   :  { %8 = vsyncpa [#allocation3], 0  ;;  %s401_s0 = inlined_call_operand.hbm [shape: f32[1,128], index: 0, kind: input, shape index: {}]   ;;  %s402_s1 = inlined_call_operand.hbm [shape: f32[128,256], index: 1, kind: input, shape index: {}]   ;;  %s403_s2 = inlined_call_operand.vmem [shape: f32[1,256], index: 2, kind: input, shape index: {}]   ;;  %s404_s3 = inlined_call_operand.hbm [shape: f32[1,256], index: 3, kind: output, shape index: {}]  }
   0x1   :  { %9 = vsyncpa [#allocation6], 0 }
   0x2   :  { %10 = vsyncpa [#allocation4], 0 }
   0x3   :  { %15 = vsyncadd [#allocation3], 112  ;;  %s339_s12 = smov [#allocation2]  }
   0x4   :  { %s16_s13 = sshll.u32 %s339_s12, 4  ;;  %s17_s13 = int_to_ptr.vmem [resolvable:$true] %s16_s13 }
   0x5   :  { %s281_s14 = scalar_lea.vmem %s17_s13, 16  ;;  %s285_s15 = scalar_lea.vmem %s17_s13, 128 }
   0x6   :  { %p282_p0 = scmp.ne.s32.totalorder %s17_s13, %s281_s14  ;;  %p286_p1 = scmp.lt.s32.totalorder %s17_s13, %s17_s13 }
   0x7   :  { %p287_p2 = scmp.lt.s32.totalorder %s285_s15, %s281_s14 }
   0x9   :  { %p288_p3 = por %p287_p2, %p286_p1 }
   0xb   :  { %p289_p4 = pnand %p288_p3, %p282_p0 }
   0xd   :  { %292 = shalt.err (!%p289_p4)
}
   0xe   :  { %s340_s16 = smov 16   ;;  %s341_s17 = smov 1  }
   0xf   :  { %22 = dma.hbm_to_vmem [thread:$0]  %s401_s0, 16, %s17_s13, [#allocation3], %s340_s16, %s340_s16, %s341_s17  }
  0x10   :  { %s342_s20 = smov [#allocation5]  }
  0x11   :  { %s28_s21 = sshll.u32 %s342_s20, 4  ;;  %s29_s21 = int_to_ptr.vmem [resolvable:$true] %s28_s21 }
  0x12   :  { %s301_s22 = scalar_lea.vmem %s29_s21, 4096  ;;  %p306_p6 = scmp.lt.s32.totalorder %s29_s21, %s29_s21 }
  0x13   :  { %p302_p5 = scmp.ne.s32.totalorder %s29_s21, %s301_s22  ;;  %p307_p7 = scmp.lt.s32.totalorder %s301_s22, %s301_s22 }
  0x15   :  { %p308_p8 = por %p307_p7, %p306_p6 }
  0x17   :  { %p309_p9 = pnand %p308_p8, %p302_p5 }
  0x19   :  { %312 = shalt.err (!%p309_p9)
}
  0x1a   :  { %s343_s23 = smov 256  }
  0x1b   :  { %34 = dma.hbm_to_vmem [thread:$0]  %s402_s1, 4096, %s29_s21, [#allocation6], %s343_s23, %s343_s23, %s340_s16  }
  0x1c   :  { %333 = dma.done.wait [#allocation3], 128  }
  0x1d   :  { %334 = vsyncadd [#allocation3], 4294967168 }
  0x1e   :  { %335 = dma.done.wait [#allocation6], 4096  }
  0x1f   :  { %336 = vsyncadd [#allocation6], 4294963200  ;;  %v344_v0 = vmov 0.0   ;;  %v75_v1 = vld [vmem:[#allocation5 + $0xf8] sm:$0xff]  ;;  %v74_v2 = vld [vmem:[#allocation5 + $0xf0] sm:$0xff]  ;;  %v78_v34 = vlaneseq }
  0x20   :  { %152 = vmatprep.mubr.f32.mxu0 %v344_v0  ;;  %v73_v3 = vld [vmem:[#allocation5 + $0xe8] sm:$0xff]  ;;  %88 = vmatprep.subr.mxu0 %v75_v1  ;;  %v72_v4 = vld [vmem:[#allocation5 + $0xe0] sm:$0xff]  ;;  %v71_v5 = vld [vmem:[#allocation5 + $0xd8] sm:$0xff]  ;;  %v345_v47 = vmov 1966171168  }
  0x21   :  { %89 = vmatpush1.msra.mxu0 %v74_v2  ;;  %v70_v6 = vld [vmem:[#allocation5 + $0xd0] sm:$0xff]  ;;  %v69_v7 = vld [vmem:[#allocation5 + $0xc8] sm:$0xff]  ;;  %v68_v8 = vld [vmem:[#allocation5 + $0xc0] sm:$0xff]  ;;  %v79_v35 = vshrl.u32 %v78_v34, 7  ;;  %v174_v48 = vunpack.c.l.s4 %v345_v47  ;;  %vm378_vm0 = vcmp.lt.s32.totalorder %v78_v34, 256 }
  0x22   :  { %90 = vmatprep.subr.mxu0 %v73_v3  ;;  %v67_v9 = vld [vmem:[#allocation5 + $0xb8] sm:$0xff]  ;;  %v66_v10 = vld [vmem:[#allocation5 + $0xb0] sm:$0xff]  ;;  %v65_v11 = vld [vmem:[#allocation5 + $0xa8] sm:$0xff] }
  0x23   :  { %91 = vmatpush1.msra.mxu0 %v72_v4  ;;  %v64_v12 = vld [vmem:[#allocation5 + $0xa0] sm:$0xff]  ;;  %v63_v13 = vld [vmem:[#allocation5 + $0x98] sm:$0xff]  ;;  %v62_v14 = vld [vmem:[#allocation5 + $0x90] sm:$0xff]  ;;  %v80_v36 = vsub.s32 0, %v79_v35  ;;  %v84_v38 = vsub.s32 1, %v79_v35  ;;  %v175_v51 = vunpack.c.0.s8 %v174_v48 }
  0x24   :  { %92 = vmatprep.subr.mxu0 %v71_v5  ;;  %v61_v15 = vld [vmem:[#allocation5 + $0x88] sm:$0xff]  ;;  %v60_v16 = vld [vmem:[#allocation5 + $0x80] sm:$0xff]  ;;  %v59_v17 = vld [vmem:[#allocation5 + $0x78] sm:$0xff] }
  0x25   :  { %93 = vmatpush1.msra.mxu0 %v70_v6  ;;  %v58_v18 = vld [vmem:[#allocation5 + $0x70] sm:$0xff]  ;;  %v57_v19 = vld [vmem:[#allocation5 + $0x68] sm:$0xff]  ;;  %v56_v20 = vld [vmem:[#allocation5 + $0x60] sm:$0xff]  ;;  %v178_v57 = vsub.s32 %v175_v51, %v79_v35 }
  0x26   :  { %94 = vmatprep.subr.mxu0 %v69_v7  ;;  %v55_v21 = vld [vmem:[#allocation5 + $0x58] sm:$0xff]  ;;  %v54_v22 = vld [vmem:[#allocation5 + $0x50] sm:$0xff]  ;;  %v53_v23 = vld [vmem:[#allocation5 + $0x48] sm:$0xff] }
  0x27   :  { %95 = vmatpush1.msra.mxu0 %v68_v8  ;;  %v52_v24 = vld [vmem:[#allocation5 + $0x40] sm:$0xff]  ;;  %v51_v25 = vld [vmem:[#allocation5 + $0x38] sm:$0xff]  ;;  %v50_v26 = vld [vmem:[#allocation5 + $0x30] sm:$0xff] }
  0x28   :  { %96 = vmatprep.subr.mxu0 %v67_v9  ;;  %v49_v27 = vld [vmem:[#allocation5 + $0x28] sm:$0xff]  ;;  %v48_v28 = vld [vmem:[#allocation5 + $0x20] sm:$0xff]  ;;  %v47_v29 = vld [vmem:[#allocation5 + $0x18] sm:$0xff] }
  0x29   :  { %97 = vmatpush1.msra.mxu0 %v66_v10  ;;  %v46_v30 = vld [vmem:[#allocation5 + $0x10] sm:$0xff]  ;;  %v45_v31 = vld [vmem:[#allocation5 + $0x8] sm:$0xff]  ;;  %v44_v32 = vld [vmem:[#allocation5] sm:$0xff] }
  0x2a   :  { %98 = vmatprep.subr.mxu0 %v65_v11  ;;  %v43_v33 = vld [vmem:[#allocation2] sm:$0xff]  ;;  %v76_v37 = vld [vmem:[%s403_s2] sm:$0x3] }
  0x2b   :  { %99 = vmatpush1.msra.mxu0 %v64_v12  ;;  %v81_v39 = vrot.slane %v76_v37, %v80_v36  ;;  %v85_v40 = vrot.slane %v76_v37, %v84_v38 }
  0x2c   :  { %100 = vmatprep.subr.mxu0 %v63_v13 }
  0x2d   :  { %101 = vmatpush1.msra.mxu0 %v62_v14 }
  0x2e   :  { %102 = vmatprep.subr.mxu0 %v61_v15 }
  0x2f   :  { %103 = vmatpush1.msra.mxu0 %v60_v16 }
  0x30   :  { %104 = vmatprep.subr.mxu0 %v59_v17 }
  0x31   :  { %105 = vmatpush1.msra.mxu0 %v58_v18 }
  0x32   :  { %106 = vmatprep.subr.mxu0 %v57_v19 }
  0x33   :  { %107 = vmatpush1.msra.mxu0 %v56_v20 }
  0x34   :  { %108 = vmatprep.subr.mxu0 %v55_v21 }
  0x35   :  { %109 = vmatpush1.msra.mxu0 %v54_v22 }
  0x36   :  { %110 = vmatprep.subr.mxu0 %v53_v23 }
  0x37   :  { %111 = vmatpush1.msra.mxu0 %v52_v24 }
  0x38   :  { %112 = vmatprep.subr.mxu0 %v51_v25 }
  0x39   :  { %113 = vmatpush1.msra.mxu0 %v50_v26 }
  0x3a   :  { %114 = vmatprep.subr.mxu0 %v49_v27 }
  0x3b   :  { %115 = vmatpush1.msra.mxu0 %v48_v28 }
  0x3c   :  { %116 = vmatprep.subr.mxu0 %v47_v29 }
  0x3d   :  { %117 = vmatpush1.msra.mxu0 %v46_v30 }
  0x3e   :  { %118 = vmatprep.subr.mxu0 %v45_v31 }
  0x3f   :  { %119 = vmatpush1.msra.mxu0 %v44_v32 }
  0x40   :  { %153 = vmatmul.mubr.f32.vlgmr.msra.gmra.mxu0 %v43_v33 }
 0x100   :  { %v154_v41 = vpop.f32.mrf.mxu0 }
 0x101   :  { %v155_v42 = vadd.f32 %v154_v41, %v81_v39 }
 0x102   :  { %v156_v43 = vpop.f32.mrf.mxu0 }
 0x103   :  { %v161_v44 = vmul.f32 0.70710677, %v155_v42  ;;  %v157_v45 = vadd.f32 %v156_v43, %v85_v40  ;;  %v159_v53 = vmul.f32 0.5, %v155_v42 }
 0x105   :  { %269 = verf.f32 %v161_v44  ;;  %v162_v46 = vmul.f32 0.70710677, %v157_v45  ;;  %v160_v54 = vmul.f32 0.5, %v157_v45 }
 0x107   :  { %271 = verf.f32 %v162_v46 }
 0x112   :  { %v270_v49 = vpop.eup %269 }
 0x113   :  { %v165_v50 = vadd.f32 1.0, %v270_v49 }
 0x114   :  { %v272_v52 = vpop.eup %271 }
 0x115   :  { %v166_v55 = vadd.f32 1.0, %v272_v52  ;;  %v167_v56 = vmul.f32 %v165_v50, %v159_v53 }
 0x117   :  { %v168_v58 = vmul.f32 %v166_v55, %v160_v54 }
 0x119   :  { %v171_v59 = vcombine.low %v167_v56, %v168_v58  ;;  %v172_v60 = vcombine.high %v167_v56, %v168_v58 }
 0x11b   :  { %v179_v61 = vrot.slane %v171_v59, %v178_v57  ;;  %v186_v62 = vrot.slane %v172_v60, %v178_v57 }
 0x11d   :  { %v187_v0 = vcombine.high %v179_v61, %v179_v61  ;;  %v188_v1 = vcombine.high %v186_v62, %v186_v62  ;;  %v195_v2 = vrot.slane %v179_v61, %v178_v57  ;;  %v202_v3 = vrot.slane %v186_v62, %v178_v57 }
 0x11f   :  { %v209_v4 = vrot.slane %v187_v0, %v178_v57  ;;  %v216_v5 = vrot.slane %v188_v1, %v178_v57  ;;  %v217_v6 = vcombine.high %v195_v2, %v195_v2  ;;  %v218_v7 = vcombine.high %v202_v3, %v202_v3  ;;  %233 = vst.msk [vmem:[#allocation7] sm:$0x3] %vm378_vm0, %v195_v2 }
 0x120   :  { %237 = vst.msk [vmem:[#allocation7 + $0x8] sm:$0x3] %vm378_vm0, %v202_v3 }
 0x121   :  { %v219_v8 = vcombine.high %v209_v4, %v209_v4  ;;  %v220_v9 = vcombine.high %v216_v5, %v216_v5  ;;  %234 = vst.msk [vmem:[#allocation7 + $0x2] sm:$0x3] %vm378_vm0, %v209_v4  ;;  %235 = vst.msk [vmem:[#allocation7 + $0x4] sm:$0x3] %vm378_vm0, %v217_v6 }
 0x122   :  { %238 = vst.msk [vmem:[#allocation7 + $0xa] sm:$0x3] %vm378_vm0, %v216_v5  ;;  %239 = vst.msk [vmem:[#allocation7 + $0xc] sm:$0x3] %vm378_vm0, %v218_v7 }
 0x123   :  { %236 = vst.msk [vmem:[#allocation7 + $0x6] sm:$0x3] %vm378_vm0, %v219_v8  ;;  %240 = vst.msk [vmem:[#allocation7 + $0xe] sm:$0x3] %vm378_vm0, %v220_v9 }
 0x124   :  { %245 = vsyncadd [#allocation4], 224  ;;  %s346_s2 = smov [#allocation7]  }
 0x125   :  { %s246_s26 = sshll.u32 %s346_s2, 4  ;;  %s247_s26 = int_to_ptr.vmem [resolvable:$true] %s246_s26 }
 0x126   :  { %s313_s27 = scalar_lea.vmem %s247_s26, 32  ;;  %s317_s28 = scalar_lea.vmem %s247_s26, 256 }
 0x127   :  { %p314_p10 = scmp.ne.s32.totalorder %s247_s26, %s313_s27  ;;  %p318_p11 = scmp.lt.s32.totalorder %s247_s26, %s247_s26 }
 0x128   :  { %p319_p12 = scmp.lt.s32.totalorder %s317_s28, %s313_s27 }
 0x12a   :  { %p320_p13 = por %p319_p12, %p318_p11 }
 0x12c   :  { %p321_p0 = pnand %p320_p13, %p314_p10 }
 0x12e   :  { %324 = shalt.err (!%p321_p0)
}
 0x12f   :  { %s347_s29 = smov 32   ;;  %s348_s30 = smov 2  }
 0x130   :  { %252 = dma.vmem_to_hbm [thread:$0]  %s247_s26, 32, %s404_s3, [#allocation4], %s347_s29, %s347_s29, %s348_s30  }
 0x131   :  { %337 = dma.done.wait [#allocation4], 256  }
 0x132   :  { %338 = vsyncadd [#allocation4], 4294967040 }
 0x133   :  { %256 = vsyncpa [#allocation3], 1 }
 0x134   :  { %257 = vsyncpa [#allocation6], 1 }
 0x135   :  { %258 = vsyncpa [#allocation4], 1 }

</bundles_post_ra>
